<compile_context>
chip_gen: v6e
topology: v6e:2x2x1
jax: 0.10.0
libtpu: 0.0.40
codegen_flags: <defaults>
</compile_context>

<pallas_src>
import math

import jax
import jax.numpy as jnp
from jax import lax
from jax.experimental import pallas as pl
from jax.experimental.pallas import tpu as pltpu


# ------------------------------- helpers ----------------------------------- #

def _cdiv(a, b):
    return -(-a // b)


def _round_up(x, m):
    return ((x + m - 1) // m) * m


def _pick_tile(dim, align, max_tile, min_tiles=1):
    """Pick the tile count first, then TILE = round_up(cdiv(dim, n), align).

    Minimizes boundary padding (B=300 -> 152x2) instead of the old
    min(round_up(dim, align), cap) scheme (B=300 -> 256 -> 512 padded rows).
    Returned tile is either a multiple of `align` or the full `dim`, so the
    (8, 128) BlockSpec rule is always satisfied.
    """
    max_tile = max(align, (max_tile // align) * align)
    n = max(min_tiles, _cdiv(dim, max_tile))
    if n <= 1:
        return dim                                   # one full-extent block
    tile = _round_up(_cdiv(dim, n), align)
    return dim if tile >= dim else tile


_VMEM_BUDGET = 24 * 1024 * 1024   # total (double-buffered) working-set target;
                                  # comfortably below v7x 64 MiB / v5e-v6e 128 MiB.


def _vmem_limit_bytes(single_copy_block_bytes):
    # 2x for BlockSpec double-buffering + slack for Mosaic internal scratch.
    return int(min(32 * 1024 * 1024,
                   max(8 * 1024 * 1024,
                       2 * single_copy_block_bytes + (2 << 20))))


# ------------------------------- kernels ----------------------------------- #

def _td_matmul_kernel(d_ref, wt_ref, b_ref, o_ref):
    # d: (TILE_B, I), wt: (I, TILE_O) -> natural MXU orientation, lane dim = TILE_O.
    x = jnp.dot(d_ref[...], wt_ref[...], preferred_element_type=jnp.float32)
    x = x + b_ref[...].astype(jnp.float32)              # (1, TILE_O) broadcast
    o_ref[...] = jnp.exp(-jnp.maximum(x, 0.0)).astype(o_ref.dtype)


def _td_diag_kernel(d_ref, w_ref, b_ref, o_ref):
    # diag=True is a per-column scale: pure VPU/EUP work, no MXU, no W*eye.
    x = d_ref[...].astype(jnp.float32) * w_ref[...].astype(jnp.float32)
    x = x + b_ref[...].astype(jnp.float32)
    o_ref[...] = jnp.exp(-jnp.maximum(x, 0.0)).astype(o_ref.dtype)


# ------------------------------- hot paths ---------------------------------- #

def _temporal_decay_dense(d, w_t, b2, out_dtype):
    """d: (B, I); w_t: pre-transposed weight (I, O); b2: (1, O) f32."""
    B, I = d.shape
    I_w, O = w_t.shape
    assert I_w == I and b2.shape == (1, O)
    in_bytes = d.dtype.itemsize
    out_bytes = jnp.dtype(out_dtype).itemsize

    # O tiling: keep W resident (single full-extent O block, constant index map
    # -> DMA'd once) whenever its double-buffered copy fits in a fraction of VMEM.
    if 2 * I * O * in_bytes <= _VMEM_BUDGET // 2:
        tile_o = O
    else:
        max_tile_o = max(128, (_VMEM_BUDGET // 4) // max(I * in_bytes, 1))
        tile_o = _pick_tile(O, 128, max_tile_o)

    # B tiling: fill the remaining budget; >=2 tiles when B >= 16 so both v7x
    # TensorCores get work (costs only ~0.35us/step on 1-TC v5e/v6e).
    w_blk = I * tile_o * in_bytes
    bias_blk = tile_o * 4
    row_bytes = I * in_bytes + tile_o * out_bytes
    avail = _VMEM_BUDGET // 2 - w_blk - bias_blk
    if avail < 8 * row_bytes:
        max_tile_b = 8
    else:
        max_tile_b = min(1024, (avail // row_bytes) // 8 * 8)
    min_tiles_b = 2 if B >= 16 else 1
    tile_b = _pick_tile(B, 8, max_tile_b, min_tiles=min_tiles_b)

    grid = (_cdiv(B, tile_b), _cdiv(O, tile_o))
    blk_bytes = tile_b * I * in_bytes + w_blk + bias_blk + tile_b * tile_o * out_bytes

    # No wrapper pad / post-slice: Pallas masks ragged boundary blocks; the
    # contraction axis I is always full-extent so valid outputs see no garbage.
    # (If I were large and non-128-aligned, a one-time cached zero-pad of the
    # weight along I would make the lanes dense; skipped here.)
    return pl.pallas_call(
        _td_matmul_kernel,
        out_shape=jax.ShapeDtypeStruct((B, O), out_dtype),
        grid=grid,
        in_specs=[
            pl.BlockSpec((tile_b, I), lambda i, j: (i, 0)),    # d tile
            pl.BlockSpec((I, tile_o), lambda i, j: (0, j)),    # W^T tile (lane-dense)
            pl.BlockSpec((1, tile_o), lambda i, j: (0, j)),    # bias (O-indexed only)
        ],
        out_specs=pl.BlockSpec((tile_b, tile_o), lambda i, j: (i, j)),
        compiler_params=pltpu.CompilerParams(
            dimension_semantics=("parallel", "parallel"),
            vmem_limit_bytes=_vmem_limit_bytes(blk_bytes),
        ),
        cost_estimate=pl.CostEstimate(
            flops=2 * B * I * O,
            transcendentals=B * O,
            bytes_accessed=B * I * in_bytes + I * O * in_bytes + O * 4
            + B * O * out_bytes,
        ),
    )(d, w_t, b2)


def _temporal_decay_diag(d, w2, b2, out_dtype):
    """d: (B, I); w2: diag(W) as (1, I) f32; b2: (1, I) f32."""
    B, I = d.shape
    assert w2.shape == (1, I) and b2.shape == (1, I)
    in_bytes = d.dtype.itemsize
    out_bytes = jnp.dtype(out_dtype).itemsize

    tile_i = I if I <= 4096 else _pick_tile(I, 128, 4096)
    row_bytes = tile_i * (in_bytes + out_bytes)
    avail = _VMEM_BUDGET // 2 - 2 * tile_i * 4
    if avail < 8 * row_bytes:
        max_tile_b = 8
    else:
        max_tile_b = min(1024, (avail // row_bytes) // 8 * 8)
    min_tiles_b = 2 if B >= 16 else 1
    tile_b = _pick_tile(B, 8, max_tile_b, min_tiles=min_tiles_b)

    grid = (_cdiv(B, tile_b), _cdiv(I, tile_i))
    blk_bytes = tile_b * tile_i * (in_bytes + out_bytes) + 2 * tile_i * 4

    return pl.pallas_call(
        _td_diag_kernel,
        out_shape=jax.ShapeDtypeStruct((B, I), out_dtype),
        grid=grid,
        in_specs=[
            pl.BlockSpec((tile_b, tile_i), lambda i, j: (i, j)),
            pl.BlockSpec((1, tile_i), lambda i, j: (0, j)),
            pl.BlockSpec((1, tile_i), lambda i, j: (0, j)),
        ],
        out_specs=pl.BlockSpec((tile_b, tile_i), lambda i, j: (i, j)),
        compiler_params=pltpu.CompilerParams(
            dimension_semantics=("parallel", "parallel"),
            vmem_limit_bytes=_vmem_limit_bytes(blk_bytes),
        ),
        cost_estimate=pl.CostEstimate(
            flops=2 * B * I,
            transcendentals=B * I,
            bytes_accessed=B * I * (in_bytes + out_bytes) + 2 * I * 4,
        ),
    )(d, w2, b2)


# ------------------------------- public API --------------------------------- #

def prepare_temporal_decay_params(W, b, diag=False, matmul_input_dtype=jnp.bfloat16):
    """One-time parameter prep (do at parameter init, NOT per step).

    W: (O, I) PyTorch layout.
      diag=False -> (W.T cast to matmul_input_dtype (I, O), bias (1, O) f32)
      diag=True  -> (diag(W) as (1, I) f32,                 bias (1, I) f32)
    """
    O, I = W.shape
    if diag:
        assert I == O, "diag=True requires input_size == output_size"
        return (jnp.diagonal(W).reshape(1, I).astype(jnp.float32),
                b.reshape(1, I).astype(jnp.float32))
    w_t = W.T
    if matmul_input_dtype is not None:
        w_t = w_t.astype(matmul_input_dtype)
    return w_t, b.reshape(1, O).astype(jnp.float32)


def temporal_decay(d, W, b, diag=False, matmul_input_dtype=jnp.bfloat16):
    """gamma = exp(-relu(F.linear(d, W[*I], b))), matching PyTorch TemporalDecay.

    d: (B, I); W: (O, I) PyTorch layout; b: (O,).  Returns (B, O) in d.dtype.
    matmul_input_dtype defaults to bf16 (native MXU rate + half the d/W HBM
    bytes on v5e/v6e/v7x); accumulation and the relu/exp epilogue stay f32.
    Pass None for exact f32 MXU inputs.  The diag path is element-wise and
    always computes in f32 (matmul_input_dtype is not used there).
    """
    B, I = d.shape
    O, I_w = W.shape
    assert I_w == I
    out_dtype = d.dtype

    w_prep, b2 = prepare_temporal_decay_params(
        W, b, diag=diag, matmul_input_dtype=matmul_input_dtype)
    if diag:
        return _temporal_decay_diag(d, w_prep, b2, out_dtype)

    d_in = d
    if matmul_input_dtype is not None and d.dtype != matmul_input_dtype:
        # In a real model d should already arrive in this dtype (or the cast
        # fuses into its producer); here it is an explicit small cast.
        d_in = d.astype(matmul_input_dtype)
    return _temporal_decay_dense(d_in, w_prep, b2, out_dtype)


def temporal_decay_ref(d, W, b, diag=False):
    if diag:
        W = W * jnp.eye(W.shape[0], dtype=W.dtype)
    x = jnp.dot(d, W.T, precision=lax.Precision.HIGHEST) + b
    return jnp.exp(-jnp.maximum(x, 0.0))


if __name__ == "__main__":
    key = jax.random.PRNGKey(0)
    k_d, k_w, k_b, k_d2, k_w2, k_b2 = jax.random.split(key, 6)

    # --- small shapes matching the module's forward: d is (batch, input_size)
    batch, input_size, output_size = 8, 32, 32
    stdv = 1.0 / math.sqrt(output_size)
    W = jax.random.uniform(k_w, (output_size, input_size), jnp.float32, -stdv, stdv)
    b = jax.random.uniform(k_b, (output_size,), jnp.float32, -stdv, stdv)
    d = jax.random.uniform(k_d, (batch, input_size), jnp.float32, 0.0, 2.0)

    out = jax.block_until_ready(temporal_decay(d, W, b, diag=False, matmul_input_dtype=None))
    ref = temporal_decay_ref(d, W, b, diag=False)
    assert jnp.allclose(out, ref, atol=1e-5, rtol=1e-5), "diag=False mismatch"

    out_diag = jax.block_until_ready(temporal_decay(d, W, b, diag=True))
    ref_diag = temporal_decay_ref(d, W, b, diag=True)
    assert jnp.allclose(out_diag, ref_diag, atol=1e-5, rtol=1e-5), "diag=True mismatch"

    # --- larger, non-aligned shapes: ragged boundary blocks (no wrapper pad),
    # W-resident single-O-tile path, B split into 2 tiles (152 rows each).
    B2, I2, O2 = 300, 192, 260
    stdv2 = 1.0 / math.sqrt(O2)
    W2 = jax.random.uniform(k_w2, (O2, I2), jnp.float32, -stdv2, stdv2)
    b2 = jax.random.uniform(k_b2, (O2,), jnp.float32, -stdv2, stdv2)
    d2 = jax.random.uniform(k_d2, (B2, I2), jnp.float32, 0.0, 2.0)

    ref2 = temporal_decay_ref(d2, W2, b2, diag=False)

    out2_f32 = jax.block_until_ready(
        temporal_decay(d2, W2, b2, diag=False, matmul_input_dtype=None))
    assert jnp.allclose(out2_f32, ref2, atol=1e-4, rtol=1e-4), "tiled f32 mismatch"

    # Default path: bf16 MXU inputs (recommended on v5e/v6e/v7x), f32 epilogue.
    out2_bf16 = jax.block_until_ready(temporal_decay(d2, W2, b2, diag=False))
    assert jnp.allclose(out2_bf16, ref2, atol=5e-2, rtol=5e-2), "bf16 matmul mismatch"

    print("KERNEL_OK")
</pallas_src>

<mosaic_0001>
module attributes {stable_mosaic.version = 11 : i64} {
  func.func @_td_matmul_kernel(%arg0: i32, %arg1: i32, %arg2: memref<8x32xf32, #tpu.memory_space<vmem>>, %arg3: memref<32x32xf32, #tpu.memory_space<vmem>>, %arg4: memref<1x32xf32, #tpu.memory_space<vmem>>, %arg5: memref<8x32xf32, #tpu.memory_space<vmem>>) attributes {dimension_semantics = [#tpu.dimension_semantics<parallel>, #tpu.dimension_semantics<parallel>], iteration_bounds = array<i64: 1, 1>, scalar_prefetch = 0 : i64, scratch_operands = 0 : i64, tpu.core_type = #tpu.core_type<tc>, window_params = [{transform_indices = @transform_0, window_bounds = array<i64: 8, 32>}, {transform_indices = @transform_1, window_bounds = array<i64: 32, 32>}, {transform_indices = @transform_2, window_bounds = array<i64: 1, 32>}, {transform_indices = @transform_3, window_bounds = array<i64: 8, 32>}]} {
    %c0 = arith.constant 0 : index
    %c0_0 = arith.constant 0 : index
    %0 = vector.load %arg2[%c0, %c0_0] : memref<8x32xf32, #tpu.memory_space<vmem>>, vector<8x32xf32>
    %c0_1 = arith.constant 0 : index
    %c0_2 = arith.constant 0 : index
    %1 = vector.load %arg3[%c0_1, %c0_2] : memref<32x32xf32, #tpu.memory_space<vmem>>, vector<32x32xf32>
    %cst = arith.constant dense<0.000000e+00> : vector<8x32xf32>
    %2 = tpu.matmul %0, %1, %cst {dimension_numbers = #tpu.dot_dimension_numbers<[1], [0], [0], [1], [0, 0, 1, 1], [], []>} : vector<8x32xf32>, vector<32x32xf32>, vector<8x32xf32> -> vector<8x32xf32>
    %c0_3 = arith.constant 0 : index
    %c0_4 = arith.constant 0 : index
    %3 = vector.load %arg4[%c0_3, %c0_4] : memref<1x32xf32, #tpu.memory_space<vmem>>, vector<1x32xf32>
    %4 = vector.broadcast %3 : vector<1x32xf32> to vector<8x32xf32>
    %5 = arith.addf %2, %4 : vector<8x32xf32>
    %cst_5 = arith.constant 0.000000e+00 : f32
    %6 = vector.broadcast %cst_5 : f32 to vector<8x32xf32>
    %7 = arith.maximumf %5, %6 : vector<8x32xf32>
    %cst_6 = arith.constant 0.000000e+00 : f32
    %8 = vector.broadcast %cst_6 : f32 to vector<8x32xf32>
    %9 = arith.subf %8, %7 : vector<8x32xf32>
    %10 = math.exp %9 : vector<8x32xf32>
    %c0_7 = arith.constant 0 : index
    %c0_8 = arith.constant 0 : index
    %11 = vector.load %arg5[%c0_7, %c0_8] : memref<8x32xf32, #tpu.memory_space<vmem>>, vector<8x32xf32>
    tpu.vector_store %arg5[%c0_7, %c0_8], %10 {strides = array<i32>} : memref<8x32xf32, #tpu.memory_space<vmem>>, vector<8x32xf32>,
    return
  }
  func.func @transform_0(%arg0: i32, %arg1: i32) -> (i32, i32) {
    %c0_i32 = arith.constant 0 : i32
    %c0_i32_0 = arith.constant 0 : i32
    return %arg0, %c0_i32 : i32, i32
  }
  func.func @transform_1(%arg0: i32, %arg1: i32) -> (i32, i32) {
    %c0_i32 = arith.constant 0 : i32
    %c0_i32_0 = arith.constant 0 : i32
    return %c0_i32, %arg1 : i32, i32
  }
  func.func @transform_2(%arg0: i32, %arg1: i32) -> (i32, i32) {
    %c0_i32 = arith.constant 0 : i32
    %c0_i32_0 = arith.constant 0 : i32
    return %c0_i32, %arg1 : i32, i32
  }
  func.func @transform_3(%arg0: i32, %arg1: i32) -> (i32, i32) {
    %c0_i32 = arith.constant 0 : i32
    return %arg0, %arg1 : i32, i32
  }
}

</mosaic_0001>

<bundles_post_ra>
// kernel: tpu_custom_call.1
= control target key start
LH: loop header
LB: loop body
LE: loop exit
PB: predicated region body
PF: predicated region fallthrough
CT: control target
= control target key end

     0   :  { %8 = vsyncpa [#allocation3], 0  ;;  %s282_s0 = inlined_call_operand.hbm [shape: f32[8,32], index: 0, kind: input, shape index: {}]   ;;  %s283_s1 = inlined_call_operand.hbm [shape: f32[32,32], index: 1, kind: input, shape index: {}]   ;;  %s284_s2 = inlined_call_operand.vmem [shape: f32[1,32], index: 2, kind: input, shape index: {}]   ;;  %s285_s3 = inlined_call_operand.hbm [shape: f32[8,32], index: 3, kind: output, shape index: {}]  }
   0x1   :  { %9 = vsyncpa [#allocation6], 0 }
   0x2   :  { %10 = vsyncpa [#allocation4], 0  ;;  %s241_s12 = smov [#allocation2]   ;;  %s242_s14 = smov [#allocation5]  }
   0x3   :  { %s17_s13 = sshll.u32 %s241_s12, 4  ;;  %s26_s15 = sshll.u32 %s242_s14, 4  ;;  %s18_s13 = int_to_ptr.vmem [resolvable:$true] %s17_s13  ;;  %s27_s15 = int_to_ptr.vmem [resolvable:$true] %s26_s15 }
   0x4   :  { %s183_s16 = scalar_lea.vmem %s18_s13, 128  ;;  %p188_p1 = scmp.lt.s32.totalorder %s18_s13, %s18_s13 }
   0x5   :  { %p184_p0 = scmp.ne.s32.totalorder %s18_s13, %s183_s16  ;;  %p189_p2 = scmp.lt.s32.totalorder %s183_s16, %s183_s16 }
   0x7   :  { %p190_p3 = por %p189_p2, %p188_p1 }
   0x9   :  { %p191_p4 = pnand %p190_p3, %p184_p0 }
   0xb   :  { %194 = shalt.err (!%p191_p4)
}
   0xc   :  { %20 = dma.hbm_to_vmem [thread:$0]  %s282_s0, 128, %s18_s13, [#allocation3]  }
   0xd   :  { %s203_s19 = scalar_lea.vmem %s27_s15, 512  ;;  %p208_p6 = scmp.lt.s32.totalorder %s27_s15, %s27_s15 }
   0xe   :  { %p204_p5 = scmp.ne.s32.totalorder %s27_s15, %s203_s19  ;;  %p209_p7 = scmp.lt.s32.totalorder %s203_s19, %s203_s19 }
  0x10   :  { %p210_p8 = por %p209_p7, %p208_p6 }
  0x12   :  { %p211_p9 = pnand %p210_p8, %p204_p5 }
  0x14   :  { %214 = shalt.err (!%p211_p9)
}
  0x15   :  { %s243_s20 = smov 128   ;;  %s244_s21 = smov 8  }
  0x16   :  { %32 = dma.hbm_to_vmem [thread:$0]  %s283_s1, 512, %s27_s15, [#allocation6], %s243_s20, %s243_s20, %s244_s21  }
  0x17   :  { %235 = dma.done.wait [#allocation3], 128  }
  0x18   :  { %236 = vsyncadd [#allocation3], 4294967168 }
  0x19   :  { %237 = dma.done.wait [#allocation6], 512  }
  0x1a   :  { %238 = vsyncadd [#allocation6], 4294966784  ;;  %v245_v0 = vmov 0.0   ;;  %vm246_vm0 = vmmov 0   ;;  %v45_v1 = vld [vmem:[#allocation5 + $0x18] sm:$0xff]  ;;  %v44_v2 = vld [vmem:[#allocation5 + $0x10] sm:$0xff] }
  0x1b   :  { %155 = vmatprep.subr.mxu0 %v245_v0  ;;  %163 = vmatprep.mubr.msk.f32.mxu0 %vm246_vm0, %v245_v0  ;;  %v43_v3 = vld [vmem:[#allocation5 + $0x8] sm:$0xff]  ;;  %v42_v4 = vld [vmem:[#allocation5] sm:$0xff]  ;;  %v41_v5 = vld [vmem:[#allocation2] sm:$0xff]  ;;  %vm53_vm1 = vcmask 261120   ;;  %s247_s24 = smov [#allocation7]  }
  0x1c   :  { %156 = vmatpush3.msra.mxu0 %v45_v1  ;;  %v148_v6 = vld [vmem:[%s284_s2] ss:$0 sm:$0xff]  ;;  %s138_s25 = sshll.u32 %s247_s24, 4  ;;  %s139_s25 = int_to_ptr.vmem [resolvable:$true] %s138_s25 }
  0x1d   :  { %157 = vmatprep.subr.mxu0 %v245_v0  ;;  %s215_s26 = scalar_lea.vmem %s139_s25, 128  ;;  %p220_p11 = scmp.lt.s32.totalorder %s139_s25, %s139_s25 }
  0x1e   :  { %158 = vmatpush3.msra.mxu0 %v44_v2  ;;  %p216_p10 = scmp.ne.s32.totalorder %s139_s25, %s215_s26  ;;  %p221_p12 = scmp.lt.s32.totalorder %s215_s26, %s215_s26 }
  0x1f   :  { %159 = vmatprep.subr.mxu0 %v245_v0 }
  0x20   :  { %160 = vmatpush3.msra.mxu0 %v43_v3  ;;  %p222_p13 = por %p221_p12, %p220_p11 }
  0x21   :  { %161 = vmatprep.subr.mxu0 %v245_v0 }
  0x22   :  { %162 = vmatpush3.msra.mxu0 %v42_v4  ;;  %p223_p0 = pnand %p222_p13, %p216_p10 }
  0x23   :  { %164 = vmatmul.mubr.msk.f32.vlgmr.msra.gmra.mxu0 %vm53_vm1, %v41_v5 }
  0xe3   :  { %v123_v7 = vpop.f32.mrf.mxu0 }
  0xe4   :  { %v124_v8 = vadd.f32 %v148_v6, %v123_v7 }
  0xe5   :  { %v165_v9 = vpop.f32.mrf.mxu0 }
  0xe6   :  { %v127_v10 = vmax.f32 %v124_v8, 0.0 }
  0xe8   :  { %v128_v11 = vsub.f32 0.0, %v127_v10 }
  0xea   :  { %v129_v12 = vmul.f32 1.442695, %v128_v11 }
  0xec   :  { %173 = vpow2.f32 %v129_v12 }
  0xf9   :  { %v174_v13 = vpop.eup %173 }
  0xfa   :  { %131 = vst.msk [vmem:[#allocation7] sm:$0xff] %vm53_vm1, %v174_v13 }
  0xfb   :  { %226 = shalt.err (!%p223_p0)
}
  0xfc   :  { %141 = dma.vmem_to_hbm [thread:$0]  %s139_s25, 128, %s285_s3, [#allocation4]  }
  0xfd   :  { %239 = dma.done.wait [#allocation4], 128  }
  0xfe   :  { %240 = vsyncadd [#allocation4], 4294967168 }
  0xff   :  { %145 = vsyncpa [#allocation3], 1 }
 0x100   :  { %146 = vsyncpa [#allocation6], 1 }
 0x101   :  { %147 = vsyncpa [#allocation4], 1 }

</bundles_post_ra>
